<compile_context>
chip_gen: v6e
topology: v6e:2x2x1
jax: 0.10.0
libtpu: 0.0.40
codegen_flags: <defaults>
</compile_context>

<pallas_src>
import functools

import jax
import jax.numpy as jnp
from jax.experimental import pallas as pl
from jax.experimental.pallas import tpu as pltpu


def _soil_cq_kernel(params_ref, p_ref, t_ref, e_ref,
                    s_out, h1_out, h2_out, q_out, c_out, q1_out, q2_out,
                    s_st, h1_st, h2_st, *, nm):
    k = pl.program_id(1)

    # Re-initialize the recurrent state at the first time step of each basin tile.
    @pl.when(k == 0)
    def _():
        s_st[...] = jnp.zeros_like(s_st)
        h1_st[...] = jnp.zeros_like(h1_st)
        h2_st[...] = jnp.zeros_like(h2_st)

    prm = params_ref[...]          # (8, nh) — all transforms precomputed in wrapper
    melt = prm[0:1, :]             # exp(w) + 1
    sig_wk1 = prm[1:2, :]
    sig_wk2 = prm[2:3, :]
    sig_we1 = prm[3:4, :]
    sig_we2 = prm[4:5, :]
    big_l = prm[5:6, :]            # L = exp(wl)
    a = prm[6:7, :]                # softmax(wo)
    a_r = prm[7:8, :]              # a / sigmoid(wk2) / (1 + exp(wc))

    p = p_ref[...]                 # (tile_ns, 1)
    t = t_ref[...]
    e = e_ref[...]

    s = s_st[...]                  # (tile_ns, nh)
    h1 = h1_st[...]
    h2 = h2_st[...]

    # --- snow bucket ---
    sm = jnp.maximum(t, 0.0) * melt
    m = jnp.minimum(sm, s)
    if nm > 0:
        col = jax.lax.broadcasted_iota(jnp.int32, m.shape, 1)
        m = jnp.where(col < nm, sm, m)
    s_new = s - m + jnp.where(t < 0.0, p, 0.0)
    x = jnp.where(t > 0.0, p, 0.0) + m

    # --- soil bucket ---
    e1 = e * sig_we1
    e2 = e * sig_we2
    h1a = jnp.maximum(h1 + h2 + x - big_l, 0.0)
    q1 = h1a * sig_wk1
    h2a = jnp.minimum(h1a + h2 + x, big_l)
    q2 = h2a * sig_wk2
    q3 = q2                        # torch: q3 = h2 * sigmoid(wk2) == q2
    h1_new = jnp.maximum(h1a - q1 - e1, 0.0)
    h2_new = jnp.maximum(h2a - q2 - e2 - q3, 0.0)

    # --- carry state ---
    s_st[...] = s_new
    h1_st[...] = h1_new
    h2_st[...] = h2_new

    # --- outputs ---
    s_out[...] = s_new
    h1_out[...] = h1_new
    h2_out[...] = h2_new

    q1a = q1 * a
    q2a = q2 * a
    q_tot = jnp.sum(q1a + q2a, axis=-1, keepdims=True)      # (tile_ns, 1)
    q_out[...] = q_tot
    q1_out[...] = jnp.sum(q1a, axis=-1, keepdims=True)
    q2_out[...] = jnp.sum(q2a, axis=-1, keepdims=True)
    c_out[...] = (jnp.mean(q2 * a_r + 1e-5, axis=-1, keepdims=True)
                  / (q_tot + 1e-5))


def soil_model_cq(P, T, E, w, wk1, wk2, we1, we2, wl, wo, wc,
                  *, nm=0, tile_ns=None):
    """P, T, E: (nt, ns) float32; parameters: (nh,) float32.

    Returns (Q, C, (S, H1, H2, Qs)) matching SoilModelCQ.forward (eval mode).
    """
    nt, ns = P.shape
    nh = w.shape[0]
    f32 = jnp.float32

    # TODO(synk): nn.Dropout on wo is identity in eval mode; training-mode
    # dropout (random masking of wo before softmax) is not implemented.
    a = jax.nn.softmax(wo.astype(f32))
    r = 1.0 / jax.nn.sigmoid(wk2.astype(f32)) / (1.0 + jnp.exp(wc.astype(f32)))
    params = jnp.stack([
        jnp.exp(w.astype(f32)) + 1.0,
        jax.nn.sigmoid(wk1.astype(f32)),
        jax.nn.sigmoid(wk2.astype(f32)),
        jax.nn.sigmoid(we1.astype(f32)),
        jax.nn.sigmoid(we2.astype(f32)),
        jnp.exp(wl.astype(f32)),
        a,
        a * r,
    ], axis=0)                                  # (8, nh)

    if tile_ns is None:
        tile_ns = min(512, -(-ns // 8) * 8)     # big sublane tiles, multiple of 8
    ns_pad = pl.cdiv(ns, tile_ns) * tile_ns

    def prep(z):                                # (nt, ns) -> (nt, ns_pad, 1)
        z = z.astype(f32)
        if ns_pad != ns:
            z = jnp.pad(z, ((0, 0), (0, ns_pad - ns)))
        return z[:, :, None]

    P3, T3, E3 = prep(P), prep(T), prep(E)

    param_spec = pl.BlockSpec((8, nh), lambda j, k: (0, 0))
    forc_spec = pl.BlockSpec((None, tile_ns, 1), lambda j, k: (k, j, 0))
    state_spec = pl.BlockSpec((None, tile_ns, nh), lambda j, k: (k, j, 0))
    scal_spec = pl.BlockSpec((None, tile_ns, 1), lambda j, k: (k, j, 0))

    out_shape = (
        jax.ShapeDtypeStruct((nt, ns_pad, nh), f32),   # S
        jax.ShapeDtypeStruct((nt, ns_pad, nh), f32),   # H1
        jax.ShapeDtypeStruct((nt, ns_pad, nh), f32),   # H2
        jax.ShapeDtypeStruct((nt, ns_pad, 1), f32),    # Q
        jax.ShapeDtypeStruct((nt, ns_pad, 1), f32),    # C
        jax.ShapeDtypeStruct((nt, ns_pad, 1), f32),    # sum(q1 * a)
        jax.ShapeDtypeStruct((nt, ns_pad, 1), f32),    # sum(q2 * a)
    )

    kernel = functools.partial(_soil_cq_kernel, nm=nm)

    S, H1, H2, Q, C, Q1s, Q2s = pl.pallas_call(
        kernel,
        out_shape=out_shape,
        grid_spec=pltpu.PrefetchScalarGridSpec(
            num_scalar_prefetch=0,
            grid=(ns_pad // tile_ns, nt),       # time = innermost, sequential
            in_specs=[param_spec, forc_spec, forc_spec, forc_spec],
            out_specs=(state_spec, state_spec, state_spec,
                       scal_spec, scal_spec, scal_spec, scal_spec),
            scratch_shapes=[pltpu.VMEM((tile_ns, nh), f32)] * 3,
        ),
        compiler_params=pltpu.CompilerParams(
            dimension_semantics=("parallel", "arbitrary"),
        ),
    )(params, P3, T3, E3)

    # Un-pad and assemble outputs to match the torch module's return structure.
    Q = Q[:, :ns, 0]
    C = C[:, :ns, 0]
    S = S[:, :ns, :]
    H1 = H1[:, :ns, :]
    H2 = H2[:, :ns, :]
    Qs = jnp.stack([Q1s[:, :ns, 0], Q2s[:, :ns, 0],
                    jnp.zeros((nt, ns), f32)], axis=-1)
    return Q, C, (S, H1, H2, Qs)


def soil_model_cq_ref(P, T, E, w, wk1, wk2, we1, we2, wl, wo, wc, *, nm=0):
    """Pure-JAX literal transcription of the torch forward (eval mode)."""
    nt, ns = P.shape
    nh = w.shape[0]
    a = jax.nn.softmax(wo)
    L = jnp.exp(wl)
    s = jnp.zeros((ns, nh), jnp.float32)
    h1 = jnp.zeros((ns, nh), jnp.float32)
    h2 = jnp.zeros((ns, nh), jnp.float32)
    S, H1, H2, Q, C, Q1, Q2 = [], [], [], [], [], [], []
    for k in range(nt):
        Pk, Tk, Ek = P[k], T[k], E[k]
        # Snow
        sm = jnp.maximum(Tk, 0.0)[:, None] * (jnp.exp(w) + 1.0)
        m = jnp.concatenate([sm[:, :nm], jnp.minimum(sm[:, nm:], s[:, nm:])],
                            axis=1)
        s = s - m + ((Tk < 0) * Pk)[:, None]
        x = ((Tk > 0) * Pk)[:, None] + m
        # Soil
        e1 = Ek[:, None] * jax.nn.sigmoid(we1)
        e2 = Ek[:, None] * jax.nn.sigmoid(we2)
        h1 = jnp.maximum(h1 + h2 + x - L, 0.0)
        q1 = h1 * jax.nn.sigmoid(wk1)
        h2 = jnp.minimum(h1 + h2 + x, L)
        q2 = h2 * jax.nn.sigmoid(wk2)
        q3 = h2 * jax.nn.sigmoid(wk2)
        h1 = jnp.maximum(h1 - q1 - e1, 0.0)
        h2 = jnp.maximum(h2 - q2 - e2 - q3, 0.0)
        # Readout
        Qk = jnp.sum((q1 + q2) * a, axis=1)
        tc = 1.0 + jnp.exp(wc)
        r = 1.0 / jax.nn.sigmoid(wk2) / tc
        ck = jnp.mean(q2 * a * r + 1e-5, axis=1) / (Qk + 1e-5)
        S.append(s); H1.append(h1); H2.append(h2)
        Q.append(Qk); C.append(ck)
        Q1.append(jnp.sum(q1 * a, axis=1)); Q2.append(jnp.sum(q2 * a, axis=1))
    Qs = jnp.stack([jnp.stack(Q1), jnp.stack(Q2),
                    jnp.zeros((nt, ns), jnp.float32)], axis=-1)
    return (jnp.stack(Q), jnp.stack(C),
            (jnp.stack(S), jnp.stack(H1), jnp.stack(H2), Qs))


if __name__ == "__main__":
    nh = 32   # hidden units
    ns = 8    # basins / sites
    nt = 8    # time steps

    key = jax.random.PRNGKey(0)
    keys = jax.random.split(key, 11)

    # reset_parameters() ranges (b, R, wk3 are unused in forward).
    w = jax.random.uniform(keys[0], (nh,), jnp.float32, minval=-1.0, maxval=2.0)
    wk1 = jax.random.uniform(keys[1], (nh,), jnp.float32, minval=-1.0, maxval=1.0)
    wk2 = jax.random.uniform(keys[2], (nh,), jnp.float32, minval=-1.0, maxval=1.0)
    we1 = jax.random.uniform(keys[3], (nh,), jnp.float32, minval=-1.0, maxval=1.0)
    we2 = jax.random.uniform(keys[4], (nh,), jnp.float32, minval=-1.0, maxval=1.0)
    wl = jax.random.uniform(keys[5], (nh,), jnp.float32, minval=-1.0, maxval=1.0)
    wo = jax.random.uniform(keys[6], (nh,), jnp.float32, minval=-1.0, maxval=1.0)
    wc = jax.random.uniform(keys[7], (nh,), jnp.float32, minval=-1.0, maxval=1.0)

    # Forcings: precipitation >= 0, temperature mixed sign, PET >= 0.
    P = jax.random.uniform(keys[8], (nt, ns), jnp.float32, minval=0.0, maxval=10.0)
    T = jax.random.uniform(keys[9], (nt, ns), jnp.float32, minval=-5.0, maxval=5.0)
    E = jax.random.uniform(keys[10], (nt, ns), jnp.float32, minval=0.0, maxval=2.0)

    Q, C, (S, H1, H2, Qs) = soil_model_cq(P, T, E, w, wk1, wk2, we1, we2,
                                          wl, wo, wc)
    jax.block_until_ready((Q, C, S, H1, H2, Qs))

    Qr, Cr, (Sr, H1r, H2r, Qsr) = soil_model_cq_ref(P, T, E, w, wk1, wk2, we1,
                                                    we2, wl, wo, wc)

    assert jnp.allclose(Q, Qr, atol=1e-4, rtol=1e-4)
    assert jnp.allclose(C, Cr, atol=1e-4, rtol=1e-4)
    assert jnp.allclose(S, Sr, atol=1e-4, rtol=1e-4)
    assert jnp.allclose(H1, H1r, atol=1e-4, rtol=1e-4)
    assert jnp.allclose(H2, H2r, atol=1e-4, rtol=1e-4)
    assert jnp.allclose(Qs, Qsr, atol=1e-4, rtol=1e-4)

    print("KERNEL_OK")
</pallas_src>

<mosaic_0001>
module attributes {stable_mosaic.version = 11 : i64} {
  func.func @_soil_cq_kernel(%arg0: i32, %arg1: i32, %arg2: memref<8x32xf32, #tpu.memory_space<vmem>>, %arg3: memref<1x8x1xf32, #tpu.memory_space<vmem>>, %arg4: memref<1x8x1xf32, #tpu.memory_space<vmem>>, %arg5: memref<1x8x1xf32, #tpu.memory_space<vmem>>, %arg6: memref<1x8x32xf32, #tpu.memory_space<vmem>>, %arg7: memref<1x8x32xf32, #tpu.memory_space<vmem>>, %arg8: memref<1x8x32xf32, #tpu.memory_space<vmem>>, %arg9: memref<1x8x1xf32, #tpu.memory_space<vmem>>, %arg10: memref<1x8x1xf32, #tpu.memory_space<vmem>>, %arg11: memref<1x8x1xf32, #tpu.memory_space<vmem>>, %arg12: memref<1x8x1xf32, #tpu.memory_space<vmem>>, %arg13: memref<8x32xf32, #tpu.memory_space<vmem>>, %arg14: memref<8x32xf32, #tpu.memory_space<vmem>>, %arg15: memref<8x32xf32, #tpu.memory_space<vmem>>) attributes {dimension_semantics = [#tpu.dimension_semantics<parallel>, #tpu.dimension_semantics<arbitrary>], iteration_bounds = array<i64: 1, 8>, scalar_prefetch = 0 : i64, scratch_operands = 3 : i64, tpu.core_type = #tpu.core_type<tc>, window_params = [{pipeline_mode = #tpu.pipeline_mode<synchronous>, transform_indices = @transform_0, window_bounds = array<i64: 8, 32>}, {transform_indices = @transform_1, window_bounds = array<i64: 1, 8, 1>}, {transform_indices = @transform_2, window_bounds = array<i64: 1, 8, 1>}, {transform_indices = @transform_3, window_bounds = array<i64: 1, 8, 1>}, {transform_indices = @transform_4, window_bounds = array<i64: 1, 8, 32>}, {transform_indices = @transform_5, window_bounds = array<i64: 1, 8, 32>}, {transform_indices = @transform_6, window_bounds = array<i64: 1, 8, 32>}, {transform_indices = @transform_7, window_bounds = array<i64: 1, 8, 1>}, {transform_indices = @transform_8, window_bounds = array<i64: 1, 8, 1>}, {transform_indices = @transform_9, window_bounds = array<i64: 1, 8, 1>}, {transform_indices = @transform_10, window_bounds = array<i64: 1, 8, 1>}]} {
    %c0_i32 = arith.constant 0 : i32
    %0 = arith.cmpi eq, %arg1, %c0_i32 : i32
    %1 = arith.extui %0 : i1 to i32
    %c0_i32_0 = arith.constant 0 : i32
    %2 = arith.cmpi ne, %1, %c0_i32_0 : i32
    scf.if %2 {
      %cst_58 = arith.constant 0.000000e+00 : f32
      %115 = vector.broadcast %cst_58 : f32 to vector<8x32xf32>
      %c0_59 = arith.constant 0 : index
      %c0_60 = arith.constant 0 : index
      %116 = vector.load %arg13[%c0_59, %c0_60] : memref<8x32xf32, #tpu.memory_space<vmem>>, vector<8x32xf32>
      tpu.vector_store %arg13[%c0_59, %c0_60], %115 {strides = array<i32>} : memref<8x32xf32, #tpu.memory_space<vmem>>, vector<8x32xf32>,
      %cst_61 = arith.constant 0.000000e+00 : f32
      %117 = vector.broadcast %cst_61 : f32 to vector<8x32xf32>
      %c0_62 = arith.constant 0 : index
      %c0_63 = arith.constant 0 : index
      %118 = vector.load %arg14[%c0_62, %c0_63] : memref<8x32xf32, #tpu.memory_space<vmem>>, vector<8x32xf32>
      tpu.vector_store %arg14[%c0_62, %c0_63], %117 {strides = array<i32>} : memref<8x32xf32, #tpu.memory_space<vmem>>, vector<8x32xf32>,
      %cst_64 = arith.constant 0.000000e+00 : f32
      %119 = vector.broadcast %cst_64 : f32 to vector<8x32xf32>
      %c0_65 = arith.constant 0 : index
      %c0_66 = arith.constant 0 : index
      %120 = vector.load %arg15[%c0_65, %c0_66] : memref<8x32xf32, #tpu.memory_space<vmem>>, vector<8x32xf32>
      tpu.vector_store %arg15[%c0_65, %c0_66], %119 {strides = array<i32>} : memref<8x32xf32, #tpu.memory_space<vmem>>, vector<8x32xf32>,
    } else {
    }
    %c0 = arith.constant 0 : index
    %c0_1 = arith.constant 0 : index
    %3 = vector.load %arg2[%c0, %c0_1] : memref<8x32xf32, #tpu.memory_space<vmem>>, vector<8x32xf32>
    %4 = vector.extract_strided_slice %3 {offsets = [0, 0], sizes = [1, 32], strides = [1, 1]} : vector<8x32xf32> to vector<1x32xf32>
    %5 = vector.extract_strided_slice %3 {offsets = [1, 0], sizes = [1, 32], strides = [1, 1]} : vector<8x32xf32> to vector<1x32xf32>
    %6 = vector.extract_strided_slice %3 {offsets = [2, 0], sizes = [1, 32], strides = [1, 1]} : vector<8x32xf32> to vector<1x32xf32>
    %7 = vector.extract_strided_slice %3 {offsets = [3, 0], sizes = [1, 32], strides = [1, 1]} : vector<8x32xf32> to vector<1x32xf32>
    %8 = vector.extract_strided_slice %3 {offsets = [4, 0], sizes = [1, 32], strides = [1, 1]} : vector<8x32xf32> to vector<1x32xf32>
    %9 = vector.extract_strided_slice %3 {offsets = [5, 0], sizes = [1, 32], strides = [1, 1]} : vector<8x32xf32> to vector<1x32xf32>
    %10 = vector.extract_strided_slice %3 {offsets = [6, 0], sizes = [1, 32], strides = [1, 1]} : vector<8x32xf32> to vector<1x32xf32>
    %11 = vector.extract_strided_slice %3 {offsets = [7, 0], sizes = [1, 32], strides = [1, 1]} : vector<8x32xf32> to vector<1x32xf32>
    %c0_2 = arith.constant 0 : index
    %c0_3 = arith.constant 0 : index
    %c0_4 = arith.constant 0 : index
    %12 = vector.load %arg3[%c0_2, %c0_3, %c0_4] : memref<1x8x1xf32, #tpu.memory_space<vmem>>, vector<1x8x1xf32>
    %13 = vector.shape_cast %12 : vector<1x8x1xf32> to vector<8x1xf32>
    %c0_5 = arith.constant 0 : index
    %c0_6 = arith.constant 0 : index
    %c0_7 = arith.constant 0 : index
    %14 = vector.load %arg4[%c0_5, %c0_6, %c0_7] : memref<1x8x1xf32, #tpu.memory_space<vmem>>, vector<1x8x1xf32>
    %15 = vector.shape_cast %14 : vector<1x8x1xf32> to vector<8x1xf32>
    %c0_8 = arith.constant 0 : index
    %c0_9 = arith.constant 0 : index
    %c0_10 = arith.constant 0 : index
    %16 = vector.load %arg5[%c0_8, %c0_9, %c0_10] : memref<1x8x1xf32, #tpu.memory_space<vmem>>, vector<1x8x1xf32>
    %17 = vector.shape_cast %16 : vector<1x8x1xf32> to vector<8x1xf32>
    %c0_11 = arith.constant 0 : index
    %c0_12 = arith.constant 0 : index
    %18 = vector.load %arg13[%c0_11, %c0_12] : memref<8x32xf32, #tpu.memory_space<vmem>>, vector<8x32xf32>
    %c0_13 = arith.constant 0 : index
    %c0_14 = arith.constant 0 : index
    %19 = vector.load %arg14[%c0_13, %c0_14] : memref<8x32xf32, #tpu.memory_space<vmem>>, vector<8x32xf32>
    %c0_15 = arith.constant 0 : index
    %c0_16 = arith.constant 0 : index
    %20 = vector.load %arg15[%c0_15, %c0_16] : memref<8x32xf32, #tpu.memory_space<vmem>>, vector<8x32xf32>
    %cst = arith.constant 0.000000e+00 : f32
    %21 = vector.broadcast %cst : f32 to vector<8x1xf32>
    %22 = arith.maximumf %15, %21 : vector<8x1xf32>
    %23 = vector.broadcast %22 : vector<8x1xf32> to vector<8x32xf32>
    %24 = vector.broadcast %4 : vector<1x32xf32> to vector<8x32xf32>
    %25 = arith.mulf %23, %24 : vector<8x32xf32>
    %26 = arith.minimumf %25, %18 : vector<8x32xf32>
    %27 = arith.subf %18, %26 : vector<8x32xf32>
    %cst_17 = arith.constant 0.000000e+00 : f32
    %28 = vector.broadcast %cst_17 : f32 to vector<8x1xf32>
    %29 = arith.cmpf olt, %15, %28 : vector<8x1xf32>
    %cst_18 = arith.constant 0.000000e+00 : f32
    %30 = vector.broadcast %cst_18 : f32 to vector<8x1xf32>
    %31 = arith.select %29, %13, %30 : vector<8x1xi1>, vector<8x1xf32>
    %32 = vector.broadcast %31 : vector<8x1xf32> to vector<8x32xf32>
    %33 = arith.addf %27, %32 : vector<8x32xf32>
    %cst_19 = arith.constant 0.000000e+00 : f32
    %34 = vector.broadcast %cst_19 : f32 to vector<8x1xf32>
    %35 = arith.cmpf ogt, %15, %34 : vector<8x1xf32>
    %cst_20 = arith.constant 0.000000e+00 : f32
    %36 = vector.broadcast %cst_20 : f32 to vector<8x1xf32>
    %37 = arith.select %35, %13, %36 : vector<8x1xi1>, vector<8x1xf32>
    %38 = vector.broadcast %37 : vector<8x1xf32> to vector<8x32xf32>
    %39 = arith.addf %38, %26 : vector<8x32xf32>
    %40 = vector.broadcast %17 : vector<8x1xf32> to vector<8x32xf32>
    %41 = vector.broadcast %7 : vector<1x32xf32> to vector<8x32xf32>
    %42 = arith.mulf %40, %41 : vector<8x32xf32>
    %43 = vector.broadcast %17 : vector<8x1xf32> to vector<8x32xf32>
    %44 = vector.broadcast %8 : vector<1x32xf32> to vector<8x32xf32>
    %45 = arith.mulf %43, %44 : vector<8x32xf32>
    %46 = arith.addf %19, %20 : vector<8x32xf32>
    %47 = arith.addf %46, %39 : vector<8x32xf32>
    %48 = vector.broadcast %9 : vector<1x32xf32> to vector<8x32xf32>
    %49 = arith.subf %47, %48 : vector<8x32xf32>
    %cst_21 = arith.constant 0.000000e+00 : f32
    %50 = vector.broadcast %cst_21 : f32 to vector<8x32xf32>
    %51 = arith.maximumf %49, %50 : vector<8x32xf32>
    %52 = vector.broadcast %5 : vector<1x32xf32> to vector<8x32xf32>
    %53 = arith.mulf %51, %52 : vector<8x32xf32>
    %54 = arith.addf %51, %20 : vector<8x32xf32>
    %55 = arith.addf %54, %39 : vector<8x32xf32>
    %56 = vector.broadcast %9 : vector<1x32xf32> to vector<8x32xf32>
    %57 = arith.minimumf %55, %56 : vector<8x32xf32>
    %58 = vector.broadcast %6 : vector<1x32xf32> to vector<8x32xf32>
    %59 = arith.mulf %57, %58 : vector<8x32xf32>
    %60 = arith.subf %51, %53 : vector<8x32xf32>
    %61 = arith.subf %60, %42 : vector<8x32xf32>
    %cst_22 = arith.constant 0.000000e+00 : f32
    %62 = vector.broadcast %cst_22 : f32 to vector<8x32xf32>
    %63 = arith.maximumf %61, %62 : vector<8x32xf32>
    %64 = arith.subf %57, %59 : vector<8x32xf32>
    %65 = arith.subf %64, %45 : vector<8x32xf32>
    %66 = arith.subf %65, %59 : vector<8x32xf32>
    %cst_23 = arith.constant 0.000000e+00 : f32
    %67 = vector.broadcast %cst_23 : f32 to vector<8x32xf32>
    %68 = arith.maximumf %66, %67 : vector<8x32xf32>
    %c0_24 = arith.constant 0 : index
    %c0_25 = arith.constant 0 : index
    %69 = vector.load %arg13[%c0_24, %c0_25] : memref<8x32xf32, #tpu.memory_space<vmem>>, vector<8x32xf32>
    tpu.vector_store %arg13[%c0_24, %c0_25], %33 {strides = array<i32>} : memref<8x32xf32, #tpu.memory_space<vmem>>, vector<8x32xf32>,
    %c0_26 = arith.constant 0 : index
    %c0_27 = arith.constant 0 : index
    %70 = vector.load %arg14[%c0_26, %c0_27] : memref<8x32xf32, #tpu.memory_space<vmem>>, vector<8x32xf32>
    tpu.vector_store %arg14[%c0_26, %c0_27], %63 {strides = array<i32>} : memref<8x32xf32, #tpu.memory_space<vmem>>, vector<8x32xf32>,
    %c0_28 = arith.constant 0 : index
    %c0_29 = arith.constant 0 : index
    %71 = vector.load %arg15[%c0_28, %c0_29] : memref<8x32xf32, #tpu.memory_space<vmem>>, vector<8x32xf32>
    tpu.vector_store %arg15[%c0_28, %c0_29], %68 {strides = array<i32>} : memref<8x32xf32, #tpu.memory_space<vmem>>, vector<8x32xf32>,
    %c0_30 = arith.constant 0 : index
    %c0_31 = arith.constant 0 : index
    %c0_32 = arith.constant 0 : index
    %72 = vector.load %arg6[%c0_30, %c0_31, %c0_32] : memref<1x8x32xf32, #tpu.memory_space<vmem>>, vector<1x8x32xf32>
    %73 = vector.shape_cast %72 : vector<1x8x32xf32> to vector<8x32xf32>
    %74 = vector.shape_cast %33 : vector<8x32xf32> to vector<1x8x32xf32>
    tpu.vector_store %arg6[%c0_30, %c0_31, %c0_32], %74 {strides = array<i32>} : memref<1x8x32xf32, #tpu.memory_space<vmem>>, vector<1x8x32xf32>,
    %c0_33 = arith.constant 0 : index
    %c0_34 = arith.constant 0 : index
    %c0_35 = arith.constant 0 : index
    %75 = vector.load %arg7[%c0_33, %c0_34, %c0_35] : memref<1x8x32xf32, #tpu.memory_space<vmem>>, vector<1x8x32xf32>
    %76 = vector.shape_cast %75 : vector<1x8x32xf32> to vector<8x32xf32>
    %77 = vector.shape_cast %63 : vector<8x32xf32> to vector<1x8x32xf32>
    tpu.vector_store %arg7[%c0_33, %c0_34, %c0_35], %77 {strides = array<i32>} : memref<1x8x32xf32, #tpu.memory_space<vmem>>, vector<1x8x32xf32>,
    %c0_36 = arith.constant 0 : index
    %c0_37 = arith.constant 0 : index
    %c0_38 = arith.constant 0 : index
    %78 = vector.load %arg8[%c0_36, %c0_37, %c0_38] : memref<1x8x32xf32, #tpu.memory_space<vmem>>, vector<1x8x32xf32>
    %79 = vector.shape_cast %78 : vector<1x8x32xf32> to vector<8x32xf32>
    %80 = vector.shape_cast %68 : vector<8x32xf32> to vector<1x8x32xf32>
    tpu.vector_store %arg8[%c0_36, %c0_37, %c0_38], %80 {strides = array<i32>} : memref<1x8x32xf32, #tpu.memory_space<vmem>>, vector<1x8x32xf32>,
    %81 = vector.broadcast %10 : vector<1x32xf32> to vector<8x32xf32>
    %82 = arith.mulf %53, %81 : vector<8x32xf32>
    %83 = vector.broadcast %10 : vector<1x32xf32> to vector<8x32xf32>
    %84 = arith.mulf %59, %83 : vector<8x32xf32>
    %85 = arith.addf %82, %84 : vector<8x32xf32>
    %cst_39 = arith.constant dense<0.000000e+00> : vector<8xf32>
    %86 = vector.multi_reduction <add>, %85, %cst_39 [1] : vector<8x32xf32> to vector<8xf32>
    %87 = vector.shape_cast %86 : vector<8xf32> to vector<8x1xf32>
    %c0_40 = arith.constant 0 : index
    %c0_41 = arith.constant 0 : index
    %c0_42 = arith.constant 0 : index
    %88 = vector.load %arg9[%c0_40, %c0_41, %c0_42] : memref<1x8x1xf32, #tpu.memory_space<vmem>>, vector<1x8x1xf32>
    %89 = vector.shape_cast %88 : vector<1x8x1xf32> to vector<8x1xf32>
    %90 = vector.shape_cast %87 : vector<8x1xf32> to vector<1x8x1xf32>
    tpu.vector_store %arg9[%c0_40, %c0_41, %c0_42], %90 {strides = array<i32>} : memref<1x8x1xf32, #tpu.memory_space<vmem>>, vector<1x8x1xf32>,
    %cst_43 = arith.constant dense<0.000000e+00> : vector<8xf32>
    %91 = vector.multi_reduction <add>, %82, %cst_43 [1] : vector<8x32xf32> to vector<8xf32>
    %92 = vector.shape_cast %91 : vector<8xf32> to vector<8x1xf32>
    %c0_44 = arith.constant 0 : index
    %c0_45 = arith.constant 0 : index
    %c0_46 = arith.constant 0 : index
    %93 = vector.load %arg11[%c0_44, %c0_45, %c0_46] : memref<1x8x1xf32, #tpu.memory_space<vmem>>, vector<1x8x1xf32>
    %94 = vector.shape_cast %93 : vector<1x8x1xf32> to vector<8x1xf32>
    %95 = vector.shape_cast %92 : vector<8x1xf32> to vector<1x8x1xf32>
    tpu.vector_store %arg11[%c0_44, %c0_45, %c0_46], %95 {strides = array<i32>} : memref<1x8x1xf32, #tpu.memory_space<vmem>>, vector<1x8x1xf32>,
    %cst_47 = arith.constant dense<0.000000e+00> : vector<8xf32>
    %96 = vector.multi_reduction <add>, %84, %cst_47 [1] : vector<8x32xf32> to vector<8xf32>
    %97 = vector.shape_cast %96 : vector<8xf32> to vector<8x1xf32>
    %c0_48 = arith.constant 0 : index
    %c0_49 = arith.constant 0 : index
    %c0_50 = arith.constant 0 : index
    %98 = vector.load %arg12[%c0_48, %c0_49, %c0_50] : memref<1x8x1xf32, #tpu.memory_space<vmem>>, vector<1x8x1xf32>
    %99 = vector.shape_cast %98 : vector<1x8x1xf32> to vector<8x1xf32>
    %100 = vector.shape_cast %97 : vector<8x1xf32> to vector<1x8x1xf32>
    tpu.vector_store %arg12[%c0_48, %c0_49, %c0_50], %100 {strides = array<i32>} : memref<1x8x1xf32, #tpu.memory_space<vmem>>, vector<1x8x1xf32>,
    %101 = vector.broadcast %11 : vector<1x32xf32> to vector<8x32xf32>
    %102 = arith.mulf %59, %101 : vector<8x32xf32>
    %cst_51 = arith.constant 9.99999974E-6 : f32
    %103 = vector.broadcast %cst_51 : f32 to vector<8x32xf32>
    %104 = arith.addf %102, %103 : vector<8x32xf32>
    %cst_52 = arith.constant dense<0.000000e+00> : vector<8xf32>
    %105 = vector.multi_reduction <add>, %104, %cst_52 [1] : vector<8x32xf32> to vector<8xf32>
    %106 = vector.shape_cast %105 : vector<8xf32> to vector<8x1xf32>
    %cst_53 = arith.constant 3.200000e+01 : f32
    %107 = vector.broadcast %cst_53 : f32 to vector<8x1xf32>
    %108 = arith.divf %106, %107 : vector<8x1xf32>
    %cst_54 = arith.constant 9.99999974E-6 : f32
    %109 = vector.broadcast %cst_54 : f32 to vector<8x1xf32>
    %110 = arith.addf %87, %109 : vector<8x1xf32>
    %111 = arith.divf %108, %110 : vector<8x1xf32>
    %c0_55 = arith.constant 0 : index
    %c0_56 = arith.constant 0 : index
    %c0_57 = arith.constant 0 : index
    %112 = vector.load %arg10[%c0_55, %c0_56, %c0_57] : memref<1x8x1xf32, #tpu.memory_space<vmem>>, vector<1x8x1xf32>
    %113 = vector.shape_cast %112 : vector<1x8x1xf32> to vector<8x1xf32>
    %114 = vector.shape_cast %111 : vector<8x1xf32> to vector<1x8x1xf32>
    tpu.vector_store %arg10[%c0_55, %c0_56, %c0_57], %114 {strides = array<i32>} : memref<1x8x1xf32, #tpu.memory_space<vmem>>, vector<1x8x1xf32>,
    return
  }
  func.func @transform_0(%arg0: i32, %arg1: i32) -> (i32, i32) {
    %c0_i32 = arith.constant 0 : i32
    %c0_i32_0 = arith.constant 0 : i32
    %c0_i32_1 = arith.constant 0 : i32
    return %c0_i32, %c0_i32_0 : i32, i32
  }
  func.func @transform_1(%arg0: i32, %arg1: i32) -> (i32, i32, i32) {
    %c0_i32 = arith.constant 0 : i32
    %c0_i32_0 = arith.constant 0 : i32
    return %arg1, %arg0, %c0_i32 : i32, i32, i32
  }
  func.func @transform_2(%arg0: i32, %arg1: i32) -> (i32, i32, i32) {
    %c0_i32 = arith.constant 0 : i32
    %c0_i32_0 = arith.constant 0 : i32
    return %arg1, %arg0, %c0_i32 : i32, i32, i32
  }
  func.func @transform_3(%arg0: i32, %arg1: i32) -> (i32, i32, i32) {
    %c0_i32 = arith.constant 0 : i32
    %c0_i32_0 = arith.constant 0 : i32
    return %arg1, %arg0, %c0_i32 : i32, i32, i32
  }
  func.func @transform_4(%arg0: i32, %arg1: i32) -> (i32, i32, i32) {
    %c0_i32 = arith.constant 0 : i32
    %c0_i32_0 = arith.constant 0 : i32
    return %arg1, %arg0, %c0_i32 : i32, i32, i32
  }
  func.func @transform_5(%arg0: i32, %arg1: i32) -> (i32, i32, i32) {
    %c0_i32 = arith.constant 0 : i32
    %c0_i32_0 = arith.constant 0 : i32
    return %arg1, %arg0, %c0_i32 : i32, i32, i32
  }
  func.func @transform_6(%arg0: i32, %arg1: i32) -> (i32, i32, i32) {
    %c0_i32 = arith.constant 0 : i32
    %c0_i32_0 = arith.constant 0 : i32
    return %arg1, %arg0, %c0_i32 : i32, i32, i32
  }
  func.func @transform_7(%arg0: i32, %arg1: i32) -> (i32, i32, i32) {
    %c0_i32 = arith.constant 0 : i32
    %c0_i32_0 = arith.constant 0 : i32
    return %arg1, %arg0, %c0_i32 : i32, i32, i32
  }
  func.func @transform_8(%arg0: i32, %arg1: i32) -> (i32, i32, i32) {
    %c0_i32 = arith.constant 0 : i32
    %c0_i32_0 = arith.constant 0 : i32
    return %arg1, %arg0, %c0_i32 : i32, i32, i32
  }
  func.func @transform_9(%arg0: i32, %arg1: i32) -> (i32, i32, i32) {
    %c0_i32 = arith.constant 0 : i32
    %c0_i32_0 = arith.constant 0 : i32
    return %arg1, %arg0, %c0_i32 : i32, i32, i32
  }
  func.func @transform_10(%arg0: i32, %arg1: i32) -> (i32, i32, i32) {
    %c0_i32 = arith.constant 0 : i32
    %c0_i32_0 = arith.constant 0 : i32
    return %arg1, %arg0, %c0_i32 : i32, i32, i32
  }
}

</mosaic_0001>

<bundles_post_ra>
// kernel: tpu_custom_call.1
= control target key start
LH: loop header
LB: loop body
LE: loop exit
PB: predicated region body
PF: predicated region fallthrough
CT: control target
= control target key end

     0   :  { %s1581_s0 = inlined_call_operand.vmem [shape: f32[8,32], index: 0, kind: input, shape index: {}]   ;;  %s1582_s1 = inlined_call_operand.vmem [shape: f32[8,8,1], index: 1, kind: input, shape index: {}]   ;;  %s1583_s2 = inlined_call_operand.vmem [shape: f32[8,8,1], index: 2, kind: input, shape index: {}]   ;;  %s1584_s3 = inlined_call_operand.vmem [shape: f32[8,8,1], index: 3, kind: input, shape index: {}]   ;;  %s1585_s4 = inlined_call_operand.hbm [shape: f32[8,8,32], index: 4, kind: output, shape index: {0}]   ;;  %s1586_s5 = inlined_call_operand.hbm [shape: f32[8,8,32], index: 5, kind: output, shape index: {1}]   ;;  %s1587_s6 = inlined_call_operand.hbm [shape: f32[8,8,32], index: 6, kind: output, shape index: {2}]   ;;  %s1588_s7 = inlined_call_operand.vmem [shape: f32[8,8,1], index: 7, kind: output, shape index: {3}]   ;;  %s1589_s8 = inlined_call_operand.vmem [shape: f32[8,8,1], index: 8, kind: output, shape index: {4}]   ;;  %s1590_s9 = inlined_call_operand.vmem [shape: f32[8,8,1], index: 9, kind: output, shape index: {5}]   ;;  %s1591_s10 = inlined_call_operand.vmem [shape: f32[8,8,1], index: 10, kind: output, shape index: {6}]  }
   0x1   :  { %1603 = sst [smem:[#allocation19_spill]] %s1582_s1 }
   0x2   :  { %1604 = sst [smem:[#allocation20_spill]] %s1583_s2 }
   0x3   :  { %1605 = sst [smem:[#allocation21_spill]] %s1585_s4 }
   0x4   :  { %1606 = sst [smem:[#allocation22_spill]] %s1587_s6 }
   0x5   :  { %16 = vsyncpa [#allocation6], 0 }
   0x6   :  { %18 = vsyncpa [#allocation6 + $0x1], 0 }
   0x7   :  { %19 = vsyncpa [#allocation8], 0 }
   0x8   :  { %21 = vsyncpa [#allocation8 + $0x1], 0  ;;  %s1329_s13 = smov 0   ;;  %s1331_s14 = smov 0  }
   0x9   :  { %s1333_s15 = smov 0   ;;  %s1335_s16 = smov 0  }
   0xa   :  { %s1337_s17 = smov 0   ;;  %s1339_s18 = smov 0  }
   0xb LB: > { %1607 = sst [smem:[#allocation12_spill]] %s1247_s13  ;;  %s1594_s19 = sadd.s32 4294967295, %s1267_s18   ;;  %s1267_s18 = sphi %s1339_s18, %s27_s18   ;;  %s1263_s17 = sphi %s1337_s17, %s1631_s17   ;;  %s1259_s16 = sphi %s1335_s16, %s1630_s16   ;;  %s1255_s15 = sphi %s1333_s15, %s1629_s15   ;;  %s1251_s14 = sphi %s1331_s14, %s1628_s14   ;;  %s1247_s13 = sphi %s1329_s13, %s1627_s13  }
   0xc   : > { %1608 = sst [smem:[#allocation13_spill]] %s1251_s14  ;;  %s1592_s20 = sadd.s32 4294967294, %s1267_s18  }
   0xd   : > { %1609 = sst [smem:[#allocation14_spill]] %s1255_s15  ;;  %s36_s21 = sadd.s32 1, %s1263_s17 }
   0xe   : > { %1610 = sst [smem:[#allocation15_spill]] %s1263_s17  ;;  %s153_s22 = sadd.s32 1, %s1255_s15 }
   0xf   : > { %p37_p0 = scmp.ge.s32.totalorder %s36_s21, 8  ;;  %p163_p1 = scmp.ne.s32.totalorder %s1255_s15, %s1251_s14 }
  0x10   : > { %p164_p2 = scmp.eq.s32.totalorder %s1594_s19, 7  ;;  %p169_p3 = scmp.ne.s32.totalorder %s1251_s14, %s1247_s13 }
  0x11   : > { %s1633_s21 = smov (%p37_p0, %s36_s21), 0  ;;  %p170_p5 = scmp.eq.s32.totalorder %s1592_s20, 7 }
  0x12   : > { %1611 = sst [smem:[#allocation16_spill]] %s1633_s21  ;;  %p1371_p4 = por %p164_p2, %p163_p1 }
  0x13   : > { %s148_s24 = ssub.s32 %s1263_s17, %s1633_s21  ;;  %p1044_p6 = scmp.ge.s32.totalorder %s1267_s18, 1 }
  0x14   : > { %p151_p7 = scmp.eq.s32.totalorder %s148_s24, 0  ;;  %p1380_p8 = por %p170_p5, %p169_p3 }
  0x15   : > { %p389_p9 = scmp.lt.s32.totalorder %s1267_s18, 9 }
  0x16   : > { %s1613_s25 = scalar_select %p1380_p8, 1, 0 }
  0x17   : > { %s1386_s26 = scalar_select %p151_p7, %s1255_s15, %s153_s22  }
  0x18   : > { %1614 = sst [smem:[#allocation17_spill]] %s1613_s25  ;;  %p390_p10 = pnand %p1044_p6, %p389_p9 }
  0x19   : > { %1615 = sst [smem:[#allocation18_spill]] %s1386_s26  ;;  %s1593_s27 = sand.u32 (!%p390_p10), 1, %s1251_s14  }
  0x1a   : > { %393 = sbr.rel (%p390_p10) target bundleno = 358 (0x166), region = 36  ;;  %p481_p11 = scmp.lt.s32.totalorder (!%p390_p10), %s1259_s16, 7 }
  0x1b   : > { %s1392_s28 = sshll.u32 (!%p390_p10), %s1593_s27, 3  ;;  %s1616_s1 = sld [smem:[#allocation19_spill]] (!%p390_p10) }
  0x1c   : > { %s1617_s2 = sld [smem:[#allocation20_spill]] (!%p390_p10)  ;;  %s430_s24 = scalar_lea.vmem (!%p390_p10), [#allocation5], %s1392_s28 }
  0x1d   : > { %s444_s19 = scalar_lea.vmem (!%p390_p10), [#allocation9], %s1392_s28  ;;  %p1055_p12 = scmp.ne.s32.totalorder (!%p390_p10), %s1259_s16, 0 }
  0x1f   : > { %s482_s29 = scalar_select %p481_p11, %s1259_s16, 7 }
  0x21   : > { %s1395_s30 = sshll.u32 %s482_s29, 3  ;;  %533 = sbr.rel (%p1055_p12) target bundleno = 41 (0x29), region = 40 }
  0x22   : > { %s487_s22 = scalar_lea.vmem %s1616_s1, %s1395_s30  ;;  %s494_s27 = scalar_lea.vmem %s1617_s2, %s1395_s30 }
  0x23   : > { %s501_s29 = scalar_lea.vmem %s1584_s3, %s1395_s30  ;;  %s508_s15 = scalar_lea.vmem %s1588_s7, %s1395_s30 }
  0x24   : > { %s522_s1 = scalar_lea.vmem %s1590_s9, %s1395_s30  ;;  %s529_s20 = scalar_lea.vmem %s1591_s10, %s1395_s30 }
  0x25   : > { %s437_s2 = scalar_lea.vmem [#allocation7], %s1392_s28 }
  0x26   : > { %vm534_vm0 = vcmask 261120   ;;  %v1269_v0 = vmov 0.0  }
  0x27   : > { %535 = vst.msk [vmem:[#allocation2] sm:$0xff] %vm534_vm0, %v1269_v0  ;;  %536 = vst.msk [vmem:[#allocation3] sm:$0xff] %vm534_vm0, %v1269_v0 }
  0x28   : > { %537 = vst.msk [vmem:[#allocation4] sm:$0xff] %vm534_vm0, %v1269_v0 }
  0x29 PF: > { %v540_v1 = vld [vmem:[%s494_s27] sm:$0xff]  ;;  %v1270_v2 = vmov 0   ;;  %v551_v8 = vlaneseq  ;;  %vm617_vm3 = vcmask 261120   ;;  %s1618_s13 = sadd.s32 4294967295, %s1267_s18   ;;  %s1458_s17 = sshll.u32 %s1259_s16, 7 }
  0x2a   : > { %1131 = vset.pattern.permute.xlu0 %v1270_v2  ;;  %v545_v3 = vmax.f32 %v540_v1, 0.0  ;;  %v539_v4 = vld [vmem:[%s487_s22] sm:$0xff]  ;;  %vm566_vm1 = vcmp.gt.f32.partialorder %v540_v1, 0.0  ;;  %1132 = vset.pattern.permute.xlu1 %v1270_v2  ;;  %vm558_vm2 = vcmp.lt.f32.partialorder %v540_v1, 0.0  ;;  %s1455_s14 = sand.u32 1, %s1618_s13   ;;  %s724_s27 = scalar_lea.hbm %s1586_s5, %s1458_s17 }
  0x2b   : > { %v567_v5 = vsel %vm566_vm1, %v539_v4, 0.0  ;;  %v541_v6 = vld [vmem:[%s501_s29] sm:$0xff]  ;;  %v1429_v7 = vsel %vm558_vm2, %v539_v4, 0.0  ;;  %v552_v9 = vshrl.u32 %v551_v8, 7  ;;  %s726_s22 = sshll.u32 %s437_s2, 4  ;;  %s665_s29 = scalar_lea.sflag [#allocation8], %s1455_s14  ;;  %s727_s22 = int_to_ptr.vmem [resolvable:$true] %s726_s22 }
  0x2c   : > { %548 = vperm.xlu0 %1131, %v545_v3   ;;  %v538_v11 = vld [vmem:[%s1581_s0] sm:$0xff]  ;;  %s1135_s11 = scalar_lea.vmem %s727_s22, 128  ;;  %s1271_s12 = smov [#allocation7]  }
  0x2d   : > { %v553_v10 = vsub.s32 0, %v552_v9  ;;  %v593_v18 = vsub.s32 5, %v552_v9  ;;  %v599_v24 = vsub.s32 1, %v552_v9  ;;  %v581_v26 = vsub.s32 3, %v552_v9  ;;  %p1136_p13 = scmp.ne.s32.totalorder %s727_s22, %s1135_s11  ;;  %s1139_s4 = sshll.u32 %s1271_s12, 4  ;;  %s1140_s4 = int_to_ptr.vmem [resolvable:$false] %s1139_s4 }
  0x2e   : > { %v1434_v14 = vld [vmem:[#allocation2] sm:$0xff]  ;;  %v543_v15 = vld [vmem:[#allocation3] sm:$0xff]  ;;  %v626_v27 = vsub.s32 6, %v552_v9  ;;  %v607_v30 = vsub.s32 2, %v552_v9  ;;  %v586_v34 = vsub.s32 4, %v552_v9  ;;  %v646_v38 = vsub.s32 7, %v552_v9  ;;  %p1142_p2 = scmp.lt.s32.totalorder %s727_s22, %s1140_s4 }
  0x2f   : > { %v554_v12 = vrot.slane %v538_v11, %v553_v10  ;;  %v544_v16 = vld [vmem:[#allocation4] sm:$0xff]  ;;  %v594_v23 = vrot.slane %v538_v11, %v593_v18  ;;  %v600_v29 = vrot.slane %v538_v11, %v599_v24  ;;  %v582_v32 = vrot.slane %v538_v11, %v581_v26  ;;  %p1137_p0 = pnand %p1136_p13, %p1371_p4  ;;  %s1141_s6 = scalar_lea.vmem %s1140_s4, 256 }
  0x30   : > { %570 = vperm.xlu0 %1131, %v567_v5   ;;  %v589_v19 = vadd.f32 %v544_v16, %v543_v15  ;;  %v627_v33 = vrot.slane %v538_v11, %v626_v27  ;;  %v608_v39 = vrot.slane %v538_v11, %v607_v30  ;;  %v587_v44 = vrot.slane %v538_v11, %v586_v34  ;;  %p1143_p3 = scmp.lt.s32.totalorder %s1141_s6, %s1135_s11 }
  0x31   : > { %v647_v48 = vrot.slane %v538_v11, %v646_v38  ;;  %p1138_p1 = pneg %p1137_p0 }
  0x32   : > { %p1144_p5 = por %p1143_p3, %p1142_p2 }
  0x34   : > { %576 = vperm.xlu0 %1131, %v541_v6   ;;  %p1145_p6 = pnand %p1144_p5, %p1138_p1 }
  0xa7   : > { %v549_v13 = vpop.permute.xlu0 %548 }
  0xa8   : > { %v555_v17 = vmul.f32 %v554_v12, %v549_v13 }
  0xaa   : > { %v1437_v20 = vmin.f32 %v555_v17, %v1434_v14 }
  0xab   : > { %v571_v21 = vpop.permute.xlu0 %570 }
  0xac   : > { %v573_v22 = vadd.f32 %v571_v21, %v1437_v20 }
  0xae   : > { %v590_v25 = vadd.f32 %v589_v19, %v573_v22 }
  0xaf   : > { %v577_v35 = vpop.permute.xlu0 %576 }
  0xb0   : > { %v595_v28 = vsub.f32 %v590_v25, %v594_v23  ;;  %v583_v41 = vmul.f32 %v582_v32, %v577_v35  ;;  %v588_v51 = vmul.f32 %v587_v44, %v577_v35 }
  0xb2   : > { %v596_v31 = vmax.f32 %v595_v28, 0.0 }
  0xb4   : > { %v602_v36 = vadd.f32 %v596_v31, %v544_v16  ;;  %v601_v37 = vmul.f32 %v600_v29, %v596_v31 }
  0xb6   : > { %v603_v40 = vadd.f32 %v602_v36, %v573_v22  ;;  %v610_v42 = vsub.f32 %v596_v31, %v601_v37  ;;  %v628_v43 = vmul.f32 %v627_v33, %v601_v37 }
  0xb8   : > { %v604_v45 = vmin.f32 %v603_v40, %v594_v23  ;;  %v611_v46 = vsub.f32 %v610_v42, %v583_v41  ;;  %v636_v47 = vsel %vm617_vm3, %v628_v43, 0.0 }
  0xb9   : > { %637 = vadd.xlane.f32.xlu1 %v636_v47 }
  0xba   : > { %v609_v49 = vmul.f32 %v608_v39, %v604_v45  ;;  %v612_v50 = vmax.f32 %v611_v46, 0.0 }
  0xbc   : > { %v613_v52 = vsub.f32 %v604_v45, %v609_v49  ;;  %619 = vst.msk [vmem:[#allocation3] sm:$0xff] %vm617_vm3, %v612_v50  ;;  %622 = vst.msk [vmem:[%s437_s2] sm:$0xff] %vm617_vm3, %v612_v50  ;;  %v629_v53 = vmul.f32 %v627_v33, %v609_v49  ;;  %v648_v54 = vmul.f32 %v647_v48, %v609_v49 }
  0xbe   : > { %v614_v55 = vsub.f32 %v613_v52, %v588_v51  ;;  %v640_v56 = vsel %vm617_vm3, %v629_v53, 0.0  ;;  %v630_v57 = vadd.f32 %v629_v53, %v628_v43  ;;  %v649_v60 = vadd.f32 1e-05, %v648_v54 }
  0xbf   : > { %641 = vadd.xlane.f32.xlu0 %v640_v56 }
  0xc0   : > { %v615_v58 = vsub.f32 %v614_v55, %v609_v49  ;;  %v631_v59 = vsel %vm617_vm3, %v630_v57, 0.0  ;;  %v650_v62 = vsel %vm617_vm3, %v649_v60, 0.0 }
  0xc1   : > { %632 = vadd.xlane.f32.xlu1 %v631_v59 }
  0xc2   : > { %v616_v61 = vmax.f32 %v615_v58, 0.0 }
  0xc4   : > { %620 = vst.msk [vmem:[#allocation4] sm:$0xff] %vm617_vm3, %v616_v61  ;;  %623 = vst.msk [vmem:[%s444_s19] sm:$0xff] %vm617_vm3, %v616_v61 }
  0xc5   : > { %651 = vadd.xlane.f32.xlu1 %v650_v62 }
  0xd6   : > { %562 = vperm.xlu1 %1132, %v1429_v7  }
  0xd7   : > { %1148 = shalt.err (!%p1145_p6)
}
  0xd8   : > { %s1149_s16 = scalar_lea.hbm %s724_s27, 128  ;;  %s1153_s21 = scalar_lea.hbm %s1586_s5, 1024 }
  0xd9   : > { %p1150_p7 = scmp.ne.s32.totalorder %s724_s27, %s1149_s16  ;;  %p1154_p11 = scmp.lt.s32.totalorder %s724_s27, %s1586_s5 }
  0xda   : > { %p1155_p12 = scmp.lt.s32.totalorder %s1153_s21, %s1149_s16 }
  0xdb   : > { %p1151_p9 = pnand %p1150_p7, %p1371_p4 }
  0xdc   : > { %p1156_p13 = por %p1155_p12, %p1154_p11 }
  0xdd   : > { %p1152_p10 = pneg %p1151_p9 }
  0xdf   : > { %p1157_p0 = pnand %p1156_p13, %p1152_p10 }
  0xe1   : > { %1160 = shalt.err (!%p1157_p0)
}
  0xe2   : > { %1065 = dma.vmem_to_hbm [thread:$0]  (%p1371_p4), %s727_s22, 128, %s724_s27, %s665_s29  }
  0xe3   : > { %s1619_s4 = sld [smem:[#allocation22_spill]]  ;;  %s740_s2 = sshll.u32 %s444_s19, 4  ;;  %s741_s2 = int_to_ptr.vmem [resolvable:$true] %s740_s2 }
  0xe4   : > { %s1161_s25 = scalar_lea.vmem %s741_s2, 128  ;;  %s1272_s16 = smov [#allocation9]  }
  0xe5   : > { %p1162_p1 = scmp.ne.s32.totalorder %s741_s2, %s1161_s25  ;;  %s1165_s13 = sshll.u32 %s1272_s16, 4  ;;  %s1166_s13 = int_to_ptr.vmem [resolvable:$false] %s1165_s13 }
  0xe6   : > { %s1167_s21 = scalar_lea.vmem %s1166_s13, 256  ;;  %p1168_p5 = scmp.lt.s32.totalorder %s741_s2, %s1166_s13 }
  0xe7   : > { %p1163_p2 = pnand %p1162_p1, %p1371_p4  ;;  %p1169_p6 = scmp.lt.s32.totalorder %s1167_s21, %s1161_s25 }
  0xe9   : > { %s738_s6 = scalar_lea.hbm %s1619_s4, %s1458_s17  ;;  %p1164_p3 = pneg %p1163_p2 }
  0xea   : > { %p1170_p7 = por %p1169_p6, %p1168_p5 }
  0xec   : > { %p1171_p9 = pnand %p1170_p7, %p1164_p3 }
  0xee   : > { %1174 = shalt.err (!%p1171_p9)
}
  0xef   : > { %s1175_s27 = scalar_lea.hbm %s738_s6, 128  ;;  %s1179_s26 = scalar_lea.hbm %s1619_s4, 1024 }
  0xf0   : > { %p1176_p10 = scmp.ne.s32.totalorder %s738_s6, %s1175_s27  ;;  %p1180_p13 = scmp.lt.s32.totalorder %s738_s6, %s1619_s4 }
  0xf1   : > { %p1181_p0 = scmp.lt.s32.totalorder %s1179_s26, %s1175_s27 }
  0xf2   : > { %p1177_p11 = pnand %p1176_p10, %p1371_p4 }
  0xf3   : > { %p1182_p1 = por %p1181_p0, %p1180_p13 }
  0xf4   : > { %p1178_p12 = pneg %p1177_p11 }
  0xf6   : > { %p1183_p2 = pnand %p1182_p1, %p1178_p12 }
  0xf8   : > { %1186 = shalt.err (!%p1183_p2)
}
  0xf9   : > { %1066 = dma.vmem_to_hbm [thread:$0]  (%p1371_p4), %s741_s2, 128, %s738_s6, %s665_s29   ;;  %vm634_vm4 = vcmask 7168   ;;  %v557_v4 = vsub.f32 %v1434_v14, %v1437_v20 }
  0xfa   : > { %s1620_s13 = sld [smem:[#allocation13_spill]]  ;;  %s1273_s11 = smov [#allocation5]  }
  0xfb   : > { %s1621_s27 = sld [smem:[#allocation21_spill]]  ;;  %s1191_s12 = sshll.u32 %s1273_s11, 4  ;;  %s1192_s12 = int_to_ptr.vmem [resolvable:$false] %s1191_s12 }
  0xfc   : > { %s1193_s25 = scalar_lea.vmem %s1192_s12, 256 }
 0x101   : > { %s1527_s19 = scalar_lea.hbm %s1621_s27, %s1458_s17 }
 0x142   : > { %v638_v63 = vpop.xlane.xlu1 %637 }
 0x143   : > { %639 = vst.msk [vmem:[%s522_s1] sm:$0xff] %vm634_vm4, %v638_v63  ;;  %s712_s1 = sshll.u32 %s430_s24, 4  ;;  %s713_s1 = int_to_ptr.vmem [resolvable:$true] %s712_s1 }
 0x144   : > { %s1187_s26 = scalar_lea.vmem %s713_s1, 128  ;;  %p1194_p7 = scmp.lt.s32.totalorder %s713_s1, %s1192_s12 }
 0x145   : > { %p1188_p3 = scmp.ne.s32.totalorder %s713_s1, %s1187_s26  ;;  %p1195_p9 = scmp.lt.s32.totalorder %s1193_s25, %s1187_s26 }
 0x147   : > { %p1189_p5 = pnand %p1188_p3, %p1371_p4  ;;  %p1196_p10 = por %p1195_p9, %p1194_p7 }
 0x148   : > { %v642_v0 = vpop.xlane.xlu0 %641 }
 0x149   : > { %643 = vst.msk [vmem:[%s529_s20] sm:$0xff] %vm634_vm4, %v642_v0  ;;  %p1190_p6 = pneg %p1189_p5 }
 0x14a   : > { %v633_v1 = vpop.xlane.xlu1 %632 }
 0x14b   : > { %635 = vst.msk [vmem:[%s508_s15] sm:$0xff] %vm634_vm4, %v633_v1  ;;  %v655_v2 = vadd.f32 1e-05, %v633_v1  ;;  %s1622_s15 = sand.u32 1, %s1620_s13   ;;  %p1197_p11 = pnand %p1196_p10, %p1190_p6 }
 0x14c   : > { %s660_s22 = scalar_lea.sflag [#allocation6], %s1622_s15 }
 0x14d   : > { %1133 = vrcp.f32 %v655_v2 }
 0x14e   : > { %v652_v3 = vpop.xlane.xlu1 %651 }
 0x152   : > { %v563_v5 = vpop.permute.xlu1 %562 }
 0x153   : > { %v565_v6 = vadd.f32 %v563_v5, %v557_v4 }
 0x155   : > { %618 = vst.msk [vmem:[#allocation2] sm:$0xff] %vm617_vm3, %v565_v6  ;;  %621 = vst.msk [vmem:[%s430_s24] sm:$0xff] %vm617_vm3, %v565_v6 }
 0x156   : > { %1200 = shalt.err (!%p1197_p11)
}
 0x157   : > { %s1201_s28 = scalar_lea.hbm %s1527_s19, 128  ;;  %s1205_s16 = scalar_lea.hbm %s1621_s27, 1024 }
 0x158   : > { %p1202_p12 = scmp.ne.s32.totalorder %s1527_s19, %s1201_s28  ;;  %p1206_p1 = scmp.lt.s32.totalorder %s1527_s19, %s1621_s27 }
 0x159   : > { %p1207_p2 = scmp.lt.s32.totalorder %s1205_s16, %s1201_s28 }
 0x15a   : > { %p1203_p13 = pnand %p1202_p12, %p1371_p4 }
 0x15b   : > { %p1208_p3 = por %p1207_p2, %p1206_p1 }
 0x15c   : > { %p1204_p0 = pneg %p1203_p13 }
 0x15e   : > { %p1209_p5 = pnand %p1208_p3, %p1204_p0 }
 0x160   : > { %1212 = shalt.err (!%p1209_p5)
}
 0x161   : > { %1064 = dma.vmem_to_hbm [thread:$0]  (%p1371_p4), %s713_s1, 128, %s1527_s19, %s660_s22   ;;  %v654_v7 = vmul.f32 0.03125, %v652_v3  ;;  %v1134_v8 = vpop.eup %1133 }
 0x162   : > { %s1623_s6 = scalar_lea.vmem %s1589_s8, %s1395_s30 }
 0x163   : > { %v657_v9 = vmul.f32 %v1134_v8, %v654_v7 }
 0x165   : > { %658 = vst.msk [vmem:[%s1623_s6] sm:$0xff] %vm634_vm4, %v657_v9 }
 0x166 PF: > { %s1624_s2 = sld [smem:[#allocation12_spill]]  ;;  %p1080_p6 = scmp.ge.s32.totalorder %s1267_s18, 2 }
 0x168   : > { %p1071_p7 = pnand %p1080_p6, %p1380_p8 }
 0x16a   : > { %p1072_p9 = pneg %p1071_p7 }
 0x16c   : > { %s764_s15 = sand.u32 1, %s1624_s2  }
 0x16d   : > { %s765_s23 = scalar_lea.sflag [#allocation6], %s764_s15 }
 0x16e   : > { %1238 = dma.done.wait (%p1072_p9), %s765_s23, 128  }
 0x16f   : > { %1240 = vsyncadd (%p1072_p9), %s765_s23, 4294967168  ;;  %s1626_s1 = sadd.s32 4294967294, %s1267_s18  }
 0x170   : > { %s773_s19 = sand.u32 1, %s1626_s1  }
 0x171   : > { %s774_s22 = scalar_lea.sflag [#allocation8], %s773_s19 }
 0x172   : > { %1242 = dma.done.wait (%p1072_p9), %s774_s22, 256  }
 0x173   : > { %1244 = vsyncadd (%p1072_p9), %s774_s22, 4294967040  ;;  %s27_s18 = sadd.s32 1, %s1267_s18   ;;  %s1627_s13 = sld [smem:[#allocation13_spill]] }
 0x174   : > { %p24_p4 = scmp.ge.s32.totalorder %s27_s18, 10   ;;  %s1628_s14 = sld [smem:[#allocation14_spill]] }
 0x175   : > { %s1629_s15 = sld [smem:[#allocation18_spill]] }
 0x176   : > { %s1630_s16 = sld [smem:[#allocation15_spill]]  ;;  %26 = sbr.rel (!%p24_p4) target bundleno = 11 (0xb), region = 161 }
 0x177   : > { %s1631_s17 = sld [smem:[#allocation16_spill]] }
 0x17b   :  { %828 = vsyncpa [#allocation6], 1 }
 0x17c   :  { %830 = vsyncpa [#allocation6 + $0x1], 1 }
 0x17d   :  { %831 = vsyncpa [#allocation8], 1 }
 0x17e   :  { %833 = vsyncpa [#allocation8 + $0x1], 1 }

</bundles_post_ra>
